<compile_context>
chip_gen: v5e
topology: v5e:2x2
jax: 0.10.0
libtpu: 0.0.40
codegen_flags: <defaults>
</compile_context>

<pallas_src>
import jax
import jax.numpy as jnp
from jax.experimental import pallas as pl
from jax.experimental.pallas import tpu as pltpu

# Make XLA (reference) and Mosaic (kernel) matmuls both use full-f32 precision.
jax.config.update("jax_default_matmul_precision", "highest")


# ---------------------------------------------------------------------------
# Pallas kernel: TE target edges per grid step.
# ---------------------------------------------------------------------------
def _catscn_kernel(xa_ref, xb_ref, arow_ref, brow_ref,
                   wij1_ref, bij1_ref, wij2_ref, bij2_ref,
                   wl1c_ref, wl1x_ref, bl1_ref, wl2_ref, bl2_ref,
                   out_ref):
    xa = xa_ref[...]                       # (TE, D)  x[tar_ei[0]]
    xb = xb_ref[...]                       # (TE, D)  x[tar_ei[1]]
    arow = arow_ref[...]                   # (TE, N)  adjacency rows of endpoint a (lane-dense)
    brow = brow_ref[...]                   # (TE, N)  adjacency rows of endpoint b

    # Common-neighbor count per edge: elementwise AND of {0,1} rows + lane-axis reduce.
    xcn = jnp.sum(arow * brow, axis=-1, keepdims=True)                       # (TE, 1)

    # xijlin: Linear(D,H) -> ReLU -> Linear(H,H), batched over TE edges.
    h = jnp.dot(xa * xb, wij1_ref[...], preferred_element_type=jnp.float32) + bij1_ref[...]
    h = jnp.maximum(h, 0.0)
    xij = jnp.dot(h, wij2_ref[...], preferred_element_type=jnp.float32) + bij2_ref[...]

    # lin: Linear(H+1,H) on cat([xcn, xij]) (decomposed) -> ReLU -> Linear(H,OUT).
    z = (xcn * wl1c_ref[...]
         + jnp.dot(xij, wl1x_ref[...], preferred_element_type=jnp.float32)
         + bl1_ref[...])
    z = jnp.maximum(z, 0.0)
    out_ref[...] = jnp.dot(z, wl2_ref[...], preferred_element_type=jnp.float32) + bl2_ref[...]


# ---------------------------------------------------------------------------
# Wrapper: per-edge row gathers (glue) + pallas_call over edge tiles.
# ---------------------------------------------------------------------------
def cat_scn_forward(params, x, adj, tar_ei, *, block_edges=128):
    N, D = x.shape
    E = tar_ei.shape[1]
    OUT = params["wl2"].shape[1]

    te = int(block_edges)
    e_pad = pl.cdiv(E, te) * te

    a_idx = tar_ei[0]
    b_idx = tar_ei[1]

    def pad(v):
        return jnp.pad(v, ((0, e_pad - E), (0, 0)))

    xa = pad(x[a_idx])                      # (Epad, D)
    xb = pad(x[b_idx])                      # (Epad, D)
    arow = pad(adj[a_idx])                  # (Epad, N)  lane-dense adjacency rows
    brow = pad(adj[b_idx])                  # (Epad, N)

    weight_names = ["wij1", "bij1", "wij2", "bij2",
                    "wl1c", "wl1x", "bl1", "wl2", "bl2"]
    weights = [params[n] for n in weight_names]

    def per_edge(width):
        return pl.BlockSpec((te, width), lambda e: (e, 0))

    def const(shape):
        return pl.BlockSpec(shape, lambda e, _n=len(shape): (0,) * _n)

    in_specs = ([per_edge(D), per_edge(D), per_edge(N), per_edge(N)]
                + [const(w.shape) for w in weights])

    out = pl.pallas_call(
        _catscn_kernel,
        out_shape=jax.ShapeDtypeStruct((e_pad, OUT), jnp.float32),
        grid_spec=pltpu.PrefetchScalarGridSpec(
            num_scalar_prefetch=0,
            grid=(e_pad // te,),
            in_specs=in_specs,
            out_specs=pl.BlockSpec((te, OUT), lambda e: (e, 0)),
        ),
        compiler_params=pltpu.CompilerParams(
            # Disjoint output blocks per step -> legal to shard across v7x TensorCores.
            dimension_semantics=("parallel",),
        ),
    )(xa, xb, arow, brow, *weights)

    return out[:E]


# ---------------------------------------------------------------------------
# Deterministic parameter init (shapes from the module __init__).
# Weights stored as (fan_in, fan_out) = torch_weight.T so the kernel right-multiplies.
# The lin.0 weight Linear(H+1, H) is split into its xcn column (wl1c) and xij block (wl1x).
# ---------------------------------------------------------------------------
def init_params(key, in_channels, hidden, out_channels):
    def linear(k, fan_in, fan_out):
        k1, k2 = jax.random.split(k)
        bound = 1.0 / float(fan_in) ** 0.5
        w = jax.random.uniform(k1, (fan_in, fan_out), jnp.float32, -bound, bound)
        b = jax.random.uniform(k2, (1, fan_out), jnp.float32, -bound, bound)
        return w, b

    keys = jax.random.split(key, 4)
    p = {}
    p["wij1"], p["bij1"] = linear(keys[0], in_channels, hidden)   # xijlin: Linear(in, H)
    p["wij2"], p["bij2"] = linear(keys[1], hidden, hidden)        #         Linear(H, H)
    wl1, p["bl1"] = linear(keys[2], hidden + 1, hidden)           # lin:    Linear(H+1, H)
    p["wl1c"] = wl1[:1, :]                                        #   row for the xcn feature
    p["wl1x"] = wl1[1:, :]                                        #   rows for the xij features
    p["wl2"], p["bl2"] = linear(keys[3], hidden, out_channels)    #         Linear(H, out)
    return p


# ---------------------------------------------------------------------------
# Pure-JAX reference (same math, vectorized over edges) for verification.
# ---------------------------------------------------------------------------
def reference_forward(params, x, adj, tar_ei):
    a, b = tar_ei[0], tar_ei[1]
    xcn = jnp.sum(adj[a] * adj[b], axis=-1, keepdims=True)                  # (E, 1)
    h = jnp.maximum((x[a] * x[b]) @ params["wij1"] + params["bij1"], 0.0)
    xij = h @ params["wij2"] + params["bij2"]                               # (E, H)
    z = jnp.maximum(xcn * params["wl1c"] + xij @ params["wl1x"] + params["bl1"], 0.0)
    return z @ params["wl2"] + params["bl2"]                                # (E, OUT)


if __name__ == "__main__":
    N, D, H, OUT, E = 16, 32, 32, 1, 16   # nodes, in_channels, hidden, out_channels, edges

    key = jax.random.PRNGKey(0)
    k_x, k_adj, k_ei, k_p = jax.random.split(key, 4)

    x = jax.random.normal(k_x, (N, D), jnp.float32)
    upper = jnp.triu((jax.random.uniform(k_adj, (N, N)) < 0.3).astype(jnp.float32), k=1)
    adj = upper + upper.T                                    # symmetric {0,1}, no self loops
    tar_ei = jax.random.randint(k_ei, (2, E), 0, N, dtype=jnp.int32)

    params = init_params(k_p, D, H, OUT)

    out = cat_scn_forward(params, x, adj, tar_ei, block_edges=8)
    out = jax.block_until_ready(out)

    ref = reference_forward(params, x, adj, tar_ei)
    assert out.shape == (E, OUT)
    if not jnp.allclose(out, ref, atol=1e-4, rtol=1e-4):
        raise AssertionError(f"kernel/reference mismatch:\n{out}\nvs\n{ref}")

    print("KERNEL_OK")
</pallas_src>

<mosaic_0001>
module attributes {stable_mosaic.version = 11 : i64} {
  func.func @_catscn_kernel(%arg0: i32, %arg1: memref<8x32xf32, #tpu.memory_space<vmem>>, %arg2: memref<8x32xf32, #tpu.memory_space<vmem>>, %arg3: memref<8x16xf32, #tpu.memory_space<vmem>>, %arg4: memref<8x16xf32, #tpu.memory_space<vmem>>, %arg5: memref<32x32xf32, #tpu.memory_space<vmem>>, %arg6: memref<1x32xf32, #tpu.memory_space<vmem>>, %arg7: memref<32x32xf32, #tpu.memory_space<vmem>>, %arg8: memref<1x32xf32, #tpu.memory_space<vmem>>, %arg9: memref<1x32xf32, #tpu.memory_space<vmem>>, %arg10: memref<32x32xf32, #tpu.memory_space<vmem>>, %arg11: memref<1x32xf32, #tpu.memory_space<vmem>>, %arg12: memref<32x1xf32, #tpu.memory_space<vmem>>, %arg13: memref<1x1xf32, #tpu.memory_space<vmem>>, %arg14: memref<8x1xf32, #tpu.memory_space<vmem>>) attributes {dimension_semantics = [#tpu.dimension_semantics<parallel>], iteration_bounds = array<i64: 2>, scalar_prefetch = 0 : i64, scratch_operands = 0 : i64, tpu.core_type = #tpu.core_type<tc>, window_params = [{transform_indices = @transform_0, window_bounds = array<i64: 8, 32>}, {transform_indices = @transform_1, window_bounds = array<i64: 8, 32>}, {transform_indices = @transform_2, window_bounds = array<i64: 8, 16>}, {transform_indices = @transform_3, window_bounds = array<i64: 8, 16>}, {pipeline_mode = #tpu.pipeline_mode<synchronous>, transform_indices = @transform_4, window_bounds = array<i64: 32, 32>}, {pipeline_mode = #tpu.pipeline_mode<synchronous>, transform_indices = @transform_5, window_bounds = array<i64: 1, 32>}, {pipeline_mode = #tpu.pipeline_mode<synchronous>, transform_indices = @transform_6, window_bounds = array<i64: 32, 32>}, {pipeline_mode = #tpu.pipeline_mode<synchronous>, transform_indices = @transform_7, window_bounds = array<i64: 1, 32>}, {pipeline_mode = #tpu.pipeline_mode<synchronous>, transform_indices = @transform_8, window_bounds = array<i64: 1, 32>}, {pipeline_mode = #tpu.pipeline_mode<synchronous>, transform_indices = @transform_9, window_bounds = array<i64: 32, 32>}, {pipeline_mode = #tpu.pipeline_mode<synchronous>, transform_indices = @transform_10, window_bounds = array<i64: 1, 32>}, {pipeline_mode = #tpu.pipeline_mode<synchronous>, transform_indices = @transform_11, window_bounds = array<i64: 32, 1>}, {pipeline_mode = #tpu.pipeline_mode<synchronous>, transform_indices = @transform_12, window_bounds = array<i64: 1, 1>}, {transform_indices = @transform_13, window_bounds = array<i64: 8, 1>}]} {
    %c0 = arith.constant 0 : index
    %c0_0 = arith.constant 0 : index
    %0 = vector.load %arg1[%c0, %c0_0] : memref<8x32xf32, #tpu.memory_space<vmem>>, vector<8x32xf32>
    %c0_1 = arith.constant 0 : index
    %c0_2 = arith.constant 0 : index
    %1 = vector.load %arg2[%c0_1, %c0_2] : memref<8x32xf32, #tpu.memory_space<vmem>>, vector<8x32xf32>
    %c0_3 = arith.constant 0 : index
    %c0_4 = arith.constant 0 : index
    %2 = vector.load %arg3[%c0_3, %c0_4] : memref<8x16xf32, #tpu.memory_space<vmem>>, vector<8x16xf32>
    %c0_5 = arith.constant 0 : index
    %c0_6 = arith.constant 0 : index
    %3 = vector.load %arg4[%c0_5, %c0_6] : memref<8x16xf32, #tpu.memory_space<vmem>>, vector<8x16xf32>
    %4 = arith.mulf %2, %3 : vector<8x16xf32>
    %cst = arith.constant dense<0.000000e+00> : vector<8xf32>
    %5 = vector.multi_reduction <add>, %4, %cst [1] : vector<8x16xf32> to vector<8xf32>
    %6 = vector.shape_cast %5 : vector<8xf32> to vector<8x1xf32>
    %7 = arith.mulf %0, %1 : vector<8x32xf32>
    %c0_7 = arith.constant 0 : index
    %c0_8 = arith.constant 0 : index
    %8 = vector.load %arg5[%c0_7, %c0_8] : memref<32x32xf32, #tpu.memory_space<vmem>>, vector<32x32xf32>
    %cst_9 = arith.constant dense<0.000000e+00> : vector<8x32xf32>
    %9 = tpu.matmul %7, %8, %cst_9 {dimension_numbers = #tpu.dot_dimension_numbers<[1], [0], [0], [1], [0, 0, 1, 1], [], []>, precision = #tpu.contract_precision<fp32>} : vector<8x32xf32>, vector<32x32xf32>, vector<8x32xf32> -> vector<8x32xf32>
    %c0_10 = arith.constant 0 : index
    %c0_11 = arith.constant 0 : index
    %10 = vector.load %arg6[%c0_10, %c0_11] : memref<1x32xf32, #tpu.memory_space<vmem>>, vector<1x32xf32>
    %11 = vector.broadcast %10 : vector<1x32xf32> to vector<8x32xf32>
    %12 = arith.addf %9, %11 : vector<8x32xf32>
    %cst_12 = arith.constant 0.000000e+00 : f32
    %13 = vector.broadcast %cst_12 : f32 to vector<8x32xf32>
    %14 = arith.maximumf %12, %13 : vector<8x32xf32>
    %c0_13 = arith.constant 0 : index
    %c0_14 = arith.constant 0 : index
    %15 = vector.load %arg7[%c0_13, %c0_14] : memref<32x32xf32, #tpu.memory_space<vmem>>, vector<32x32xf32>
    %cst_15 = arith.constant dense<0.000000e+00> : vector<8x32xf32>
    %16 = tpu.matmul %14, %15, %cst_15 {dimension_numbers = #tpu.dot_dimension_numbers<[1], [0], [0], [1], [0, 0, 1, 1], [], []>, precision = #tpu.contract_precision<fp32>} : vector<8x32xf32>, vector<32x32xf32>, vector<8x32xf32> -> vector<8x32xf32>
    %c0_16 = arith.constant 0 : index
    %c0_17 = arith.constant 0 : index
    %17 = vector.load %arg8[%c0_16, %c0_17] : memref<1x32xf32, #tpu.memory_space<vmem>>, vector<1x32xf32>
    %18 = vector.broadcast %17 : vector<1x32xf32> to vector<8x32xf32>
    %19 = arith.addf %16, %18 : vector<8x32xf32>
    %c0_18 = arith.constant 0 : index
    %c0_19 = arith.constant 0 : index
    %20 = vector.load %arg9[%c0_18, %c0_19] : memref<1x32xf32, #tpu.memory_space<vmem>>, vector<1x32xf32>
    %21 = vector.broadcast %6 : vector<8x1xf32> to vector<8x32xf32>
    %22 = vector.broadcast %20 : vector<1x32xf32> to vector<8x32xf32>
    %23 = arith.mulf %21, %22 : vector<8x32xf32>
    %c0_20 = arith.constant 0 : index
    %c0_21 = arith.constant 0 : index
    %24 = vector.load %arg10[%c0_20, %c0_21] : memref<32x32xf32, #tpu.memory_space<vmem>>, vector<32x32xf32>
    %cst_22 = arith.constant dense<0.000000e+00> : vector<8x32xf32>
    %25 = tpu.matmul %19, %24, %cst_22 {dimension_numbers = #tpu.dot_dimension_numbers<[1], [0], [0], [1], [0, 0, 1, 1], [], []>, precision = #tpu.contract_precision<fp32>} : vector<8x32xf32>, vector<32x32xf32>, vector<8x32xf32> -> vector<8x32xf32>
    %26 = arith.addf %23, %25 : vector<8x32xf32>
    %c0_23 = arith.constant 0 : index
    %c0_24 = arith.constant 0 : index
    %27 = vector.load %arg11[%c0_23, %c0_24] : memref<1x32xf32, #tpu.memory_space<vmem>>, vector<1x32xf32>
    %28 = vector.broadcast %27 : vector<1x32xf32> to vector<8x32xf32>
    %29 = arith.addf %26, %28 : vector<8x32xf32>
    %cst_25 = arith.constant 0.000000e+00 : f32
    %30 = vector.broadcast %cst_25 : f32 to vector<8x32xf32>
    %31 = arith.maximumf %29, %30 : vector<8x32xf32>
    %c0_26 = arith.constant 0 : index
    %c0_27 = arith.constant 0 : index
    %32 = vector.load %arg12[%c0_26, %c0_27] : memref<32x1xf32, #tpu.memory_space<vmem>>, vector<32x1xf32>
    %cst_28 = arith.constant dense<0.000000e+00> : vector<8x1xf32>
    %33 = tpu.matmul %31, %32, %cst_28 {dimension_numbers = #tpu.dot_dimension_numbers<[1], [0], [0], [1], [0, 0, 1, 1], [], []>, precision = #tpu.contract_precision<fp32>} : vector<8x32xf32>, vector<32x1xf32>, vector<8x1xf32> -> vector<8x1xf32>
    %c0_29 = arith.constant 0 : index
    %c0_30 = arith.constant 0 : index
    %34 = vector.load %arg13[%c0_29, %c0_30] : memref<1x1xf32, #tpu.memory_space<vmem>>, vector<1x1xf32>
    %35 = vector.broadcast %34 : vector<1x1xf32> to vector<8x1xf32>
    %36 = arith.addf %33, %35 : vector<8x1xf32>
    %c0_31 = arith.constant 0 : index
    %c0_32 = arith.constant 0 : index
    %37 = vector.load %arg14[%c0_31, %c0_32] : memref<8x1xf32, #tpu.memory_space<vmem>>, vector<8x1xf32>
    tpu.vector_store %arg14[%c0_31, %c0_32], %36 {strides = array<i32>} : memref<8x1xf32, #tpu.memory_space<vmem>>, vector<8x1xf32>,
    return
  }
  func.func @transform_0(%arg0: i32) -> (i32, i32) {
    %c0_i32 = arith.constant 0 : i32
    %c0_i32_0 = arith.constant 0 : i32
    return %arg0, %c0_i32 : i32, i32
  }
  func.func @transform_1(%arg0: i32) -> (i32, i32) {
    %c0_i32 = arith.constant 0 : i32
    %c0_i32_0 = arith.constant 0 : i32
    return %arg0, %c0_i32 : i32, i32
  }
  func.func @transform_2(%arg0: i32) -> (i32, i32) {
    %c0_i32 = arith.constant 0 : i32
    %c0_i32_0 = arith.constant 0 : i32
    return %arg0, %c0_i32 : i32, i32
  }
  func.func @transform_3(%arg0: i32) -> (i32, i32) {
    %c0_i32 = arith.constant 0 : i32
    %c0_i32_0 = arith.constant 0 : i32
    return %arg0, %c0_i32 : i32, i32
  }
  func.func @transform_4(%arg0: i32) -> (i32, i32) {
    %c0_i32 = arith.constant 0 : i32
    %c0_i32_0 = arith.constant 0 : i32
    %c0_i32_1 = arith.constant 0 : i32
    return %c0_i32, %c0_i32_0 : i32, i32
  }
  func.func @transform_5(%arg0: i32) -> (i32, i32) {
    %c0_i32 = arith.constant 0 : i32
    %c0_i32_0 = arith.constant 0 : i32
    %c0_i32_1 = arith.constant 0 : i32
    return %c0_i32, %c0_i32_0 : i32, i32
  }
  func.func @transform_6(%arg0: i32) -> (i32, i32) {
    %c0_i32 = arith.constant 0 : i32
    %c0_i32_0 = arith.constant 0 : i32
    %c0_i32_1 = arith.constant 0 : i32
    return %c0_i32, %c0_i32_0 : i32, i32
  }
  func.func @transform_7(%arg0: i32) -> (i32, i32) {
    %c0_i32 = arith.constant 0 : i32
    %c0_i32_0 = arith.constant 0 : i32
    %c0_i32_1 = arith.constant 0 : i32
    return %c0_i32, %c0_i32_0 : i32, i32
  }
  func.func @transform_8(%arg0: i32) -> (i32, i32) {
    %c0_i32 = arith.constant 0 : i32
    %c0_i32_0 = arith.constant 0 : i32
    %c0_i32_1 = arith.constant 0 : i32
    return %c0_i32, %c0_i32_0 : i32, i32
  }
  func.func @transform_9(%arg0: i32) -> (i32, i32) {
    %c0_i32 = arith.constant 0 : i32
    %c0_i32_0 = arith.constant 0 : i32
    %c0_i32_1 = arith.constant 0 : i32
    return %c0_i32, %c0_i32_0 : i32, i32
  }
  func.func @transform_10(%arg0: i32) -> (i32, i32) {
    %c0_i32 = arith.constant 0 : i32
    %c0_i32_0 = arith.constant 0 : i32
    %c0_i32_1 = arith.constant 0 : i32
    return %c0_i32, %c0_i32_0 : i32, i32
  }
  func.func @transform_11(%arg0: i32) -> (i32, i32) {
    %c0_i32 = arith.constant 0 : i32
    %c0_i32_0 = arith.constant 0 : i32
    %c0_i32_1 = arith.constant 0 : i32
    return %c0_i32, %c0_i32_0 : i32, i32
  }
  func.func @transform_12(%arg0: i32) -> (i32, i32) {
    %c0_i32 = arith.constant 0 : i32
    %c0_i32_0 = arith.constant 0 : i32
    %c0_i32_1 = arith.constant 0 : i32
    return %c0_i32, %c0_i32_0 : i32, i32
  }
  func.func @transform_13(%arg0: i32) -> (i32, i32) {
    %c0_i32 = arith.constant 0 : i32
    %c0_i32_0 = arith.constant 0 : i32
    return %arg0, %c0_i32 : i32, i32
  }
}

</mosaic_0001>

<bundles_post_ra>
// kernel: tpu_custom_call.1
= control target key start
LH: loop header
LB: loop body
LE: loop exit
PB: predicated region body
PF: predicated region fallthrough
CT: control target
= control target key end

     0   :  { %s2230_s0 = inlined_call_operand.hbm [shape: f32[16,32], index: 0, kind: input, shape index: {}]   ;;  %s2231_s1 = inlined_call_operand.hbm [shape: f32[16,32], index: 1, kind: input, shape index: {}]   ;;  %s2232_s2 = inlined_call_operand.hbm [shape: f32[16,16], index: 2, kind: input, shape index: {}]   ;;  %s2233_s3 = inlined_call_operand.hbm [shape: f32[16,16], index: 3, kind: input, shape index: {}]   ;;  %s2234_s4 = inlined_call_operand.vmem [shape: f32[32,32], index: 4, kind: input, shape index: {}]   ;;  %s2235_s5 = inlined_call_operand.vmem [shape: f32[1,32], index: 5, kind: input, shape index: {}]   ;;  %s2236_s6 = inlined_call_operand.hbm [shape: f32[32,32], index: 6, kind: input, shape index: {}]   ;;  %s2237_s7 = inlined_call_operand.vmem [shape: f32[1,32], index: 7, kind: input, shape index: {}]   ;;  %s2238_s8 = inlined_call_operand.vmem [shape: f32[1,32], index: 8, kind: input, shape index: {}]   ;;  %s2239_s9 = inlined_call_operand.hbm [shape: f32[32,32], index: 9, kind: input, shape index: {}]   ;;  %s2240_s10 = inlined_call_operand.vmem [shape: f32[1,32], index: 10, kind: input, shape index: {}]   ;;  %s2241_s11 = inlined_call_operand.vmem [shape: f32[32,1], index: 11, kind: input, shape index: {}]   ;;  %s2242_s12 = inlined_call_operand.<no memory space> [shape: f32[1,1], index: 12, kind: input, shape index: {}]   ;;  %s2243_s13 = inlined_call_operand.vmem [shape: f32[16,1], index: 13, kind: output, shape index: {}]  }
   0x1   :  { %2251 = sst [smem:[#allocation20_spill]] %s2231_s1  ;;  %v18_v0 = vstv %s2242_s12 }
   0x2   :  { %2252 = sst [smem:[#allocation21_spill]] %s2236_s6  ;;  %19 = vst [vmem:[#allocation2] sm:$0x1] %v18_v0 }
   0x3   :  { %2253 = sst [smem:[#allocation22_spill]] %s2238_s8 }
   0x4   :  { %2254 = sst [smem:[#allocation23_spill]] %s2239_s9 }
   0x5   :  { %2255 = sst [smem:[#allocation24_spill]] %s2240_s10 }
   0x6   :  { %2256 = sst [smem:[#allocation25_spill]] %s2241_s11 }
   0x7   :  { %2257 = sst [smem:[#allocation26_spill]] %s2243_s13 }
   0x8   :  { %20 = vsyncpa [#allocation4], 0 }
   0x9   :  { %22 = vsyncpa [#allocation4 + $0x1], 0 }
   0xa   :  { %23 = vsyncpa [#allocation6], 0 }
   0xb   :  { %25 = vsyncpa [#allocation6 + $0x1], 0 }
   0xc   :  { %26 = vsyncpa [#allocation9], 0 }
   0xd   :  { %28 = vsyncpa [#allocation9 + $0x1], 0 }
   0xe   :  { %29 = vsyncpa [#allocation12], 0  ;;  %s1977_s27 = smov 0   ;;  %s1979_s28 = smov 0  }
   0xf   :  { %s1981_s29 = smov 0   ;;  %s1983_s30 = smov 0  }
  0x10 LB: > { %s1996_s12 = sadd.s32 4294967295, %s1898_s30   ;;  %p55_p0 = scmp.ne.s32.totalorder %s1890_s28, %s1886_s27  ;;  %s1898_s30 = sphi %s1983_s30, %s2276_s30   ;;  %s1894_s29 = sphi %s1981_s29, %s2280_s29   ;;  %s1890_s28 = sphi %s1979_s28, %s2279_s28   ;;  %s1886_s27 = sphi %s1977_s27, %s2278_s27  }
  0x11   : > { %p56_p1 = scmp.eq.s32.totalorder %s1996_s12, 0  ;;  %p1564_p2 = scmp.ge.s32.totalorder %s1898_s30, 1 }
  0x12   : > { %p359_p3 = scmp.lt.s32.totalorder %s1898_s30, 3  ;;  %s2259_s6 = sld [smem:[#allocation21_spill]] }
  0x13   : > { %p2004_p4 = por %p56_p1, %p55_p0  ;;  %s1900_s19 = smov [#allocation10]  }
  0x14   : > { %p2011_p5 = pnand %p1564_p2, %p359_p3  ;;  %s378_s20 = sshll.u32 %s1900_s19, 4  ;;  %s379_s20 = int_to_ptr.vmem [resolvable:$true] %s378_s20 }
  0x15   : > { %s2024_s22 = sadd.s32 1, %s1898_s30   ;;  %s2244_s23 = smov 128  }
  0x16   : > { %p1602_p6 = pneg %p2011_p5  ;;  %2262 = sst [smem:[#allocation18_spill]] %s2024_s22 }
  0x17   : > { %s2245_s24 = smov 8   ;;  %s39_s25 = ssub.s32 %s1898_s30, %s2024_s22 }
  0x18   : > { %s376_s17 = sshll.u32 %s2259_s6, 4  ;;  %p2019_p7 = pnand %p1602_p6, %p56_p1  ;;  %s377_s17 = int_to_ptr.hbm [resolvable:$true] %s376_s17 }
  0x19   : > { %s42_s26 = sadd.s32 1, %s1894_s29  ;;  %p40_p8 = scmp.eq.s32.totalorder %s39_s25, 0 }
  0x1a   : > { %1605 = dma.hbm_to_vmem [thread:$0]  (!%p2019_p7), %s377_s17, 512, %s379_s20, [#allocation9], %s2244_s23, %s2244_s23, %s2245_s24  }
  0x1b   : > { %p49_p9 = scmp.ne.s32.totalorder %s1894_s29, %s1890_s28  ;;  %p50_p10 = scmp.eq.s32.totalorder %s1898_s30, 0 }
  0x1c   : > { %p1624_p11 = scmp.lt.s32.totalorder %s1898_s30, 2  ;;  %s2246_s15 = sand.u32 1, %s1894_s29  }
  0x1d   : > { %s2039_s27 = scalar_select %p40_p8, %s1894_s29, %s42_s26  }
  0x1e   : > { %p51_p12 = por %p50_p10, %p49_p9  ;;  %s2044_s16 = sshll.u32 %s2246_s15, 3 }
  0x1f   : > { %2263 = sst [smem:[#allocation19_spill]] %s2039_s27  ;;  %s2047_s19 = sshll.u32 %s1898_s30, 3 }
  0x20   : > { %p2049_p13 = pnand %p1624_p11, %p51_p12  ;;  %s2249_s20 = sand.u32 1, %s1898_s30  }
  0x21   : > { %s2265_s1 = sld [smem:[#allocation20_spill]]  ;;  %s444_s6 = scalar_lea.vmem [#allocation5], %s2044_s16 }
  0x22   : > { %s452_s27 = sshll.u32 %s444_s6, 4  ;;  %s2061_s15 = scalar_lea.sflag [#allocation6], %s2249_s20  ;;  %s453_s27 = int_to_ptr.vmem [resolvable:$true] %s452_s27 }
  0x23   : > { %p1702_p2 = pneg %p2049_p13 }
  0x27   : > { %s448_s26 = scalar_lea.hbm %s2265_s1, %s2047_s19 }
  0x28   : > { %s450_s24 = sshll.u32 %s448_s26, 4  ;;  %s1705_s26 = scalar_lea.hbm %s2265_s1, 16  ;;  %s451_s24 = int_to_ptr.hbm [resolvable:$true] %s450_s24 }
  0x29   : > { %s1698_s22 = sshra.s32 %s451_s24, 4  ;;  %s1699_s22 = int_to_ptr.hbm [resolvable:$true] %s1698_s22 }
  0x2a   : > { %s1700_s13 = scalar_lea.hbm %s1699_s22, 8  ;;  %p1706_p8 = scmp.lt.s32.totalorder %s1699_s22, %s2265_s1 }
  0x2b   : > { %p1701_p0 = scmp.ne.s32.totalorder %s1699_s22, %s1700_s13  ;;  %p1707_p9 = scmp.lt.s32.totalorder %s1705_s26, %s1700_s13 }
  0x2d   : > { %p1703_p3 = pnand %p1702_p2, %p1701_p0  ;;  %p1708_p10 = por %p1707_p9, %p1706_p8 }
  0x2f   : > { %p1704_p6 = pneg %p1703_p3 }
  0x31   : > { %p1709_p11 = pnand %p1708_p10, %p1704_p6 }
  0x33   : > { %1712 = shalt.err (!%p1709_p11)
}
  0x34   : > { %1615 = dma.hbm_to_vmem [thread:$0]  (!%p2049_p13), %s451_s24, 128, %s453_s27, %s2061_s15  }
  0x35   : > { %s2266_s9 = sld [smem:[#allocation23_spill]]  ;;  %s1903_s10 = smov [#allocation11]  }
  0x36   : > { %s398_s22 = sshll.u32 %s1903_s10, 4  ;;  %s2267_s13 = smov 8   ;;  %s399_s22 = int_to_ptr.vmem [resolvable:$true] %s398_s22 }
  0x37   : > { %s2268_s25 = smov 128   ;;  %s429_s1 = scalar_lea.hbm %s2230_s0, %s2047_s19 }
  0x38   : > { %s425_s11 = scalar_lea.vmem [#allocation3], %s2044_s16  ;;  %s431_s27 = sshll.u32 %s429_s1, 4  ;;  %s432_s27 = int_to_ptr.hbm [resolvable:$true] %s431_s27 }
  0x39   : > { %s433_s24 = sshll.u32 %s425_s11, 4  ;;  %s2269_s8 = sand.u32 1, %s1894_s29   ;;  %s434_s24 = int_to_ptr.vmem [resolvable:$true] %s433_s24 }
  0x3a   : > { %s422_s20 = scalar_lea.sflag [#allocation4], %s2269_s8 }
  0x3b   : > { %s396_s23 = sshll.u32 %s2266_s9, 4  ;;  %s1758_s9 = sshra.s32 %s432_s27, 4  ;;  %s397_s23 = int_to_ptr.hbm [resolvable:$true] %s396_s23  ;;  %s1759_s9 = int_to_ptr.hbm [resolvable:$true] %s1758_s9 }
  0x3c   : > { %1608 = dma.hbm_to_vmem [thread:$0]  (!%p2019_p7), %s397_s23, 512, %s399_s22, [#allocation12], %s2268_s25, %s2268_s25, %s2267_s13  }
  0x3d   : > { %s1760_s10 = scalar_lea.hbm %s1759_s9, 8  ;;  %s1765_s22 = scalar_lea.hbm %s2230_s0, 16 }
  0x3e   : > { %p1761_p12 = scmp.ne.s32.totalorder %s1759_s9, %s1760_s10  ;;  %p1766_p7 = scmp.lt.s32.totalorder %s1759_s9, %s2230_s0 }
  0x3f   : > { %p1767_p6 = scmp.lt.s32.totalorder %s1765_s22, %s1760_s10 }
  0x40   : > { %p1763_p0 = pnand %p1761_p12, %p1702_p2 }
  0x41   : > { %p1768_p8 = por %p1767_p6, %p1766_p7 }
  0x42   : > { %p1764_p3 = pneg %p1763_p0 }
  0x44   : > { %p1769_p9 = pnand %p1768_p8, %p1764_p3 }
  0x46   : > { %1772 = shalt.err (!%p1769_p9)
}
  0x47   : > { %1612 = dma.hbm_to_vmem [thread:$0]  (!%p2049_p13), %s432_s27, 128, %s434_s24, %s422_s20  }
  0x48   : > { %s467_s26 = scalar_lea.hbm %s2232_s2, %s2047_s19  ;;  %s463_s6 = scalar_lea.vmem [#allocation7], %s2044_s16 }
  0x49   : > { %s471_s8 = sshll.u32 %s463_s6, 4  ;;  %s469_s21 = sshll.u32 %s467_s26, 4  ;;  %s472_s8 = int_to_ptr.vmem [resolvable:$true] %s471_s8  ;;  %s470_s21 = int_to_ptr.hbm [resolvable:$true] %s469_s21 }
  0x4a   : > { %s1788_s9 = sshra.s32 %s470_s21, 4  ;;  %s1795_s24 = scalar_lea.hbm %s2232_s2, 16  ;;  %s1789_s9 = int_to_ptr.hbm [resolvable:$true] %s1788_s9 }
  0x4b   : > { %s1790_s10 = scalar_lea.hbm %s1789_s9, 8  ;;  %p1796_p0 = scmp.lt.s32.totalorder %s1789_s9, %s2232_s2 }
  0x4c   : > { %p1791_p10 = scmp.ne.s32.totalorder %s1789_s9, %s1790_s10  ;;  %p1797_p3 = scmp.lt.s32.totalorder %s1795_s24, %s1790_s10 }
  0x4e   : > { %p1793_p11 = pnand %p1791_p10, %p1702_p2  ;;  %p1798_p7 = por %p1797_p3, %p1796_p0 }
  0x50   : > { %p1794_p12 = pneg %p1793_p11 }
  0x52   : > { %p1799_p6 = pnand %p1798_p7, %p1794_p12 }
  0x54   : > { %1802 = shalt.err (!%p1799_p6)
}
  0x55   : > { %1618 = dma.hbm_to_vmem [thread:$0]  (!%p2049_p13), %s470_s21, 128, %s472_s8, %s2061_s15  }
  0x56   : > { %s486_s1 = scalar_lea.hbm %s2233_s3, %s2047_s19  ;;  %s482_s11 = scalar_lea.vmem [#allocation8], %s2044_s16 }
  0x57   : > { %s490_s26 = sshll.u32 %s482_s11, 4  ;;  %s488_s6 = sshll.u32 %s486_s1, 4  ;;  %s491_s26 = int_to_ptr.vmem [resolvable:$true] %s490_s26  ;;  %s489_s6 = int_to_ptr.hbm [resolvable:$true] %s488_s6 }
  0x58   : > { %s2270_s9 = sand.u32 1, %s1898_s30   ;;  %s1818_s23 = sshra.s32 %s489_s6, 4  ;;  %s1819_s23 = int_to_ptr.hbm [resolvable:$true] %s1818_s23 }
  0x59   : > { %s479_s10 = scalar_lea.sflag [#allocation9], %s2270_s9  ;;  %s1820_s22 = scalar_lea.hbm %s1819_s23, 8 }
  0x5a   : > { %p1821_p8 = scmp.ne.s32.totalorder %s1819_s23, %s1820_s22  ;;  %s1825_s21 = scalar_lea.hbm %s2233_s3, 16 }
  0x5b   : > { %p1826_p11 = scmp.lt.s32.totalorder %s1819_s23, %s2233_s3  ;;  %p1827_p12 = scmp.lt.s32.totalorder %s1825_s21, %s1820_s22 }
  0x5c   : > { %p1823_p9 = pnand %p1821_p8, %p1702_p2 }
  0x5d   : > { %p1828_p0 = por %p1827_p12, %p1826_p11 }
  0x5e   : > { %p1824_p10 = pneg %p1823_p9 }
  0x60   : > { %p1829_p3 = pnand %p1828_p0, %p1824_p10 }
  0x62   : > { %1832 = shalt.err (!%p1829_p3)
}
  0x63   : > { %1621 = dma.hbm_to_vmem [thread:$0]  (!%p2049_p13), %s489_s6, 128, %s491_s26, %s479_s10  }
  0x64   : > { %499 = sbr.rel (%p2011_p5) target bundleno = 738 (0x2e2), region = 72  ;;  %s501_s30 = sand.u32 (!%p2011_p5), 1, %s1890_s28  }
  0x65   : > { %s2141_s24 = sshll.u32 (!%p2011_p5), %s501_s30, 3  ;;  %s502_s27 = scalar_lea.sflag (!%p2011_p5), [#allocation4], %s501_s30 }
  0x66   : > { %s505_s20 = scalar_lea.vmem (!%p2011_p5), [#allocation3], %s2141_s24 }
  0x69   : > { %1865 = dma.done.wait (%p2004_p4), %s502_s27, 128  }
  0x6a   : > { %1867 = vsyncadd (%p2004_p4), %s502_s27, 4294967168  ;;  %s511_s17 = sand.u32 1, %s1996_s12   ;;  %s515_s18 = scalar_lea.vmem [#allocation5], %s2141_s24 }
  0x6b   : > { %s512_s13 = scalar_lea.sflag [#allocation6], %s511_s17 }
  0x6c   : > { %1869 = dma.done.wait (%p2004_p4), %s512_s13, 256  }
  0x6d   : > { %1871 = vsyncadd (%p2004_p4), %s512_s13, 4294967040  ;;  %s525_s25 = scalar_lea.vmem [#allocation7], %s2141_s24  ;;  %s532_s1 = scalar_lea.sflag [#allocation9], %s511_s17 }
  0x6e   : > { %s535_s11 = scalar_lea.vmem [#allocation8], %s2141_s24 }
  0x6f   : > { %1873 = dma.done.wait (%p2004_p4), %s532_s1, 128  }
  0x70   : > { %1875 = vsyncadd (%p2004_p4), %s532_s1, 4294967168 }
  0x71   : > { %1877 = dma.done.wait (%p56_p1), [#allocation9], 512  }
  0x72   : > { %1879 = vsyncadd (%p56_p1), [#allocation9], 4294966784 }
  0x73   : > { %1881 = dma.done.wait (%p56_p1), [#allocation12], 512  }
  0x74   : > { %1883 = vsyncadd (%p56_p1), [#allocation12], 4294966784  ;;  %v620_v1 = vld [vmem:[%s2234_s4 + $0x18] sm:$0xff]  ;;  %v619_v2 = vld [vmem:[%s2234_s4 + $0x10] sm:$0xff]  ;;  %vm625_vm0 = vcmask 261120   ;;  %vm612_vm1 = vcmask 130048  }
  0x75   : > { %v618_v3 = vld [vmem:[%s2234_s4 + $0x8] sm:$0xff]  ;;  %v641_v4 = vand.u32 4294901760, %v620_v1  ;;  %v643_v5 = vand.u32 4294901760, %v619_v2  ;;  %v617_v7 = vld [vmem:[%s2234_s4] sm:$0xff]  ;;  %v817_v36 = vld [vmem:[#allocation10 + $0x10] sm:$0xff]  ;;  %s2271_s27 = sld [smem:[#allocation25_spill]] }
  0x76   : > { %v645_v6 = vand.u32 4294901760, %v618_v3  ;;  %v607_v8 = vld [vmem:[%s505_s20] sm:$0xff]  ;;  %v608_v9 = vld [vmem:[%s515_s18] sm:$0xff]  ;;  %v647_v10 = vand.u32 4294901760, %v617_v7  ;;  %v840_v38 = vand.u32 4294901760, %v817_v36  ;;  %s2273_s9 = sld [smem:[#allocation22_spill]] }
  0x77   : > { %v616_v11 = vmul.f32 %v608_v9, %v607_v8  ;;  %v671_v12 = vsub.f32 %v620_v1, %v641_v4  ;;  %642 = vmatpush.msra.mxu0 %v641_v4  ;;  %v677_v13 = vsub.f32 %v619_v2, %v643_v5  ;;  %742 = vmatpush.msra.mxu3 %v641_v4  ;;  %v818_v34 = vld [vmem:[#allocation10 + $0x18] sm:$0xff]  ;;  %v816_v39 = vld [vmem:[#allocation10 + $0x8] sm:$0xff]  ;;  %v815_v43 = vld [vmem:[#allocation10] sm:$0xff]  ;;  %s2274_s23 = sld [smem:[#allocation24_spill]]  ;;  %p603_p1 = scmp.lt.s32.totalorder %s1996_s12, 1  ;;  %vm1411_vm2 = vcmask 7168  }
  0x78   : > { %v683_v14 = vsub.f32 %v618_v3, %v645_v6  ;;  %v689_v15 = vsub.f32 %v617_v7, %v647_v10  ;;  %v838_v35 = vand.u32 4294901760, %v818_v34  ;;  %v874_v41 = vsub.f32 %v817_v36, %v840_v38  ;;  %v1663_v58 = vld [vmem:[%s2235_s5] ss:$0 sm:$0xff]  ;;  %s2275_s21 = sld [smem:[#allocation26_spill]] }
  0x79   : > { %v627_v16 = vsel %vm625_vm0, %v616_v11, 0  ;;  %713 = vmatpush.msra.mxu2 %v671_v12  ;;  %644 = vmatpush.msra.mxu0 %v643_v5  ;;  %v672_v17 = vand.u32 4294901760, %v671_v12  ;;  %v678_v18 = vand.u32 4294901760, %v677_v13  ;;  %v842_v42 = vand.u32 4294901760, %v816_v39  ;;  %s2282_s12 = smov (!%p603_p1, %s1996_s12), 1 }
  0x7a   : > { %v649_v19 = vand.u32 4294901760, %v627_v16  ;;  %v684_v20 = vand.u32 4294901760, %v683_v14  ;;  %744 = vmatpush.msra.mxu3 %v643_v5  ;;  %v690_v21 = vand.u32 4294901760, %v689_v15  ;;  %v868_v37 = vsub.f32 %v818_v34, %v838_v35  ;;  %s1583_s22 = sshll.u32 %s2282_s12, 3 }
  0x7b   : > { %716 = vmatpush.msra.mxu2 %v677_v13  ;;  %v673_v22 = vsub.f32 %v671_v12, %v672_v17  ;;  %646 = vmatpush.msra.mxu0 %v645_v6  ;;  %v679_v23 = vsub.f32 %v677_v13, %v678_v18  ;;  %v875_v45 = vand.u32 4294901760, %v874_v41  ;;  %v880_v46 = vsub.f32 %v816_v39, %v842_v42  ;;  %s2272_s20 = smov %s2271_s27 }
  0x7c   : > { %v650_v24 = vsub.f32 %v627_v16, %v649_v19  ;;  %746 = vmatpush.msra.mxu3 %v645_v6  ;;  %v685_v25 = vsub.f32 %v683_v14, %v684_v20  ;;  %v691_v29 = vsub.f32 %v689_v15, %v690_v21  ;;  %v869_v40 = vand.u32 4294901760, %v868_v37  ;;  %v1018_v16 = vld [vmem:[#allocation11 + $0x10] sm:$0xff] }
  0x7d   : > { %v674_v26 = vand.u32 4294901760, %v673_v22  ;;  %719 = vmatpush.msra.mxu2 %v683_v14  ;;  %v680_v27 = vand.u32 4294901760, %v679_v23  ;;  %648 = vmatpush.msra.mxu0 %v647_v10  ;;  %v844_v47 = vand.u32 4294901760, %v815_v43  ;;  %v876_v49 = vsub.f32 %v874_v41, %v875_v45  ;;  %v1019_v14 = vld [vmem:[#allocation11 + $0x18] sm:$0xff]  ;;  %v1016_v23 = vld [vmem:[#allocation11] sm:$0xff] }
  0x7e   : > { %v651_v28 = vand.u32 4294901760, %v650_v24  ;;  %748 = vmatpush.msra.mxu3 %v647_v10  ;;  %v686_v30 = vand.u32 4294901760, %v685_v25  ;;  %v692_v33 = vand.u32 4294901760, %v691_v29  ;;  %v870_v44 = vsub.f32 %v868_v37, %v869_v40  ;;  %s606_s19 = scalar_lea.vmem %s2275_s21, %s1583_s22 }
  0x7f   : > { %771 = vmatpush.msrb.mxu0 %v672_v17  ;;  %675 = vmatpush.msra.mxu1 %v674_v26  ;;  %v881_v50 = vand.u32 4294901760, %v880_v46  ;;  %v886_v51 = vsub.f32 %v815_v43, %v844_v47  ;;  %v877_v52 = vand.u32 4294901760, %v876_v49 }
  0x80   : > { %722 = vmatpush.msra.mxu2 %v689_v15  ;;  %v652_v31 = vsub.f32 %v650_v24, %v651_v28  ;;  %752 = vmatmul.f32.vlgmr.msra.gmra.mxu3 %v651_v28  ;;  %v871_v48 = vand.u32 4294901760, %v870_v44  ;;  %v1035_v15 = vand.u32 4294901760, %v1019_v14 }
  0x81   : > { %725 = vmatmul.f32.vlgmr.msra.gmra.mxu2 %v650_v24  ;;  %681 = vmatpush.msra.mxu1 %v680_v27  ;;  %v882_v53 = vsub.f32 %v880_v46, %v881_v50  ;;  %v887_v54 = vand.u32 4294901760, %v886_v51  ;;  %v1041_v27 = vand.u32 4294901760, %v1016_v23 }
  0x82   : > { %v653_v32 = vand.u32 4294901760, %v652_v31  ;;  %775 = vmatpush.msrb.mxu0 %v678_v18  ;;  %839 = vmatpush.msrb.mxu2 %v838_v35  ;;  %v1065_v17 = vsub.f32 %v1019_v14, %v1035_v15  ;;  %v1037_v18 = vand.u32 4294901760, %v1018_v16 }
  0x83   : > { %687 = vmatpush.msra.mxu1 %v686_v30  ;;  %872 = vmatpush.msrb.mxu3 %v871_v48  ;;  %v883_v55 = vand.u32 4294901760, %v882_v53  ;;  %v888_v56 = vsub.f32 %v886_v51, %v887_v54  ;;  %v1083_v31 = vsub.f32 %v1016_v23, %v1041_v27 }
  0x84   : > { %654 = vmatmul.f32.vlgmr.msra.gmra.mxu0 %v653_v32  ;;  %841 = vmatpush.msrb.mxu2 %v840_v38 }
  0x85   : > { %779 = vmatpush.msrb.mxu0 %v684_v20  ;;  %693 = vmatpush.msra.mxu1 %v692_v33  ;;  %v889_v57 = vand.u32 4294901760, %v888_v56  ;;  %v1066_v20 = vand.u32 4294901760, %v1065_v17  ;;  %v1084_v34 = vand.u32 4294901760, %v1083_v31 }
  0x86   : > { %695 = vmatmul.f32.vlgmr.msra.gmra.mxu1 %v649_v19  ;;  %843 = vmatpush.msrb.mxu2 %v842_v42 }
  0x87   : > { %783 = vmatpush.msrb.mxu0 %v690_v21  ;;  %802 = vmatpush.msrb.mxu1 %v641_v4  ;;  %v1071_v21 = vsub.f32 %v1018_v16, %v1037_v18  ;;  %v1067_v24 = vsub.f32 %v1065_v17, %v1066_v20  ;;  %v1085_v36 = vsub.f32 %v1083_v31, %v1084_v34 }
  0x88   : > { %845 = vmatpush.msrb.mxu2 %v844_v47  ;;  %878 = vmatpush.msrb.mxu3 %v877_v52 }
  0x89   : > { %804 = vmatpush.msrb.mxu1 %v643_v5  ;;  %910 = vmatpush.msra.mxu0 %v868_v37  ;;  %v1072_v25 = vand.u32 4294901760, %v1071_v21  ;;  %v1068_v28 = vand.u32 4294901760, %v1067_v24  ;;  %v1086_v37 = vand.u32 4294901760, %v1085_v36 }
  0x8a   : > { %968 = vmatpush.msra.mxu2 %v869_v40  ;;  %884 = vmatpush.msrb.mxu3 %v883_v55 }
  0x8b   : > { %806 = vmatpush.msrb.mxu1 %v645_v6  ;;  %913 = vmatpush.msra.mxu0 %v874_v41  ;;  %v1073_v29 = vsub.f32 %v1071_v21, %v1072_v25  ;;  %v609_v41 = vld [vmem:[%s525_s25] sm:$0xff] }
  0x8c   : > { %785 = vmatmul.f32.vlgmr.msrb.gmra.mxu0 %v649_v19  ;;  %972 = vmatpush.msra.mxu2 %v875_v45 }
  0x8d   : > { %808 = vmatpush.msrb.mxu1 %v647_v10  ;;  %916 = vmatpush.msra.mxu0 %v880_v46  ;;  %v1074_v32 = vand.u32 4294901760, %v1073_v29 }
  0x8e   : > { %810 = vmatmul.f32.vlgmr.msrb.gmra.mxu1 %v649_v19  ;;  %976 = vmatpush.msra.mxu2 %v881_v50  ;;  %v1017_v19 = vld [vmem:[#allocation11 + $0x8] sm:$0xff] }
  0x8f   : > { %939 = vmatpush.msra.mxu1 %v838_v35  ;;  %919 = vmatpush.msra.mxu0 %v886_v51  ;;  %v1039_v22 = vand.u32 4294901760, %v1017_v19 }
  0x90   : > { %890 = vmatpush.msrb.mxu3 %v889_v57  ;;  %980 = vmatpush.msra.mxu2 %v887_v54 }
  0x91   : > { %941 = vmatpush.msra.mxu1 %v840_v38  ;;  %1036 = vmatpush.msrb.mxu0 %v1035_v15  ;;  %v1077_v26 = vsub.f32 %v1017_v19, %v1039_v22 }
  0x92   : > { %999 = vmatpush.msra.mxu3 %v838_v35 }
  0x93   : > { %943 = vmatpush.msra.mxu1 %v842_v42  ;;  %1038 = vmatpush.msrb.mxu0 %v1037_v18  ;;  %v1078_v30 = vand.u32 4294901760, %v1077_v26 }
  0x94   : > { %1001 = vmatpush.msra.mxu3 %v840_v38  ;;  %v1664_v38 = vld [vmem:[%s2237_s7] ss:$0 sm:$0xff] }
  0x95   : > { %945 = vmatpush.msra.mxu1 %v844_v47  ;;  %1040 = vmatpush.msrb.mxu0 %v1039_v22  ;;  %v1079_v33 = vsub.f32 %v1077_v26, %v1078_v30 }
  0x96   : > { %1003 = vmatpush.msra.mxu3 %v842_v42  ;;  %v610_v42 = vld [vmem:[%s535_s11] sm:$0xff] }
  0x97   : > { %1042 = vmatpush.msrb.mxu0 %v1041_v27  ;;  %1069 = vmatpush.msrb.mxu1 %v1068_v28  ;;  %v1080_v35 = vand.u32 4294901760, %v1079_v33  ;;  %v611_v44 = vmul.f32 %v610_v42, %v609_v41 }
  0x98   : > { %1005 = vmatpush.msra.mxu3 %v844_v47 }
  0x99   : > { %1075 = vmatpush.msrb.mxu1 %v1074_v32  ;;  %v613_v46 = vsel %vm612_vm1, %v611_v44, 0.0 }
  0x9a   : > { %614 = vadd.xlane.f32.xlu0 %v613_v46 }
  0x9b   : > { %1081 = vmatpush.msrb.mxu1 %v1080_v35  ;;  %v1666_v35 = vld [vmem:[%s2274_s23] ss:$0 sm:$0xff] }
  0x9d   : > { %1087 = vmatpush.msrb.mxu1 %v1086_v37 }
 0x101   : > { %v655_v59 = vpop.f32.mrf.mxu0 }
 0x102   : > { %v656_v60 = vadd.f32 %v1663_v58, %v655_v59 }
 0x103   : > { %v696_v61 = vpop.f32.mrf.mxu1  ;;  %v753_v0 = vpop.f32.mrf.mxu3 }
 0x104   : > { %v726_v62 = vpop.f32.mrf.mxu2  ;;  %v697_v63 = vadd.f32 %v696_v61, %v656_v60  ;;  %v1218_v61 = vld [vmem:[%s2271_s27 + $0x18] sm:$0xff] }
 0x106   : > { %v727_v1 = vadd.f32 %v726_v62, %v697_v63  ;;  %v1238_v62 = vand.u32 4294901760, %v1218_v61  ;;  %v1217_v63 = vld [vmem:[%s2272_s20 + $0x10] sm:$0xff] }
 0x108   : > { %v754_v2 = vadd.f32 %v753_v0, %v727_v1  ;;  %v1268_v0 = vsub.f32 %v1218_v61, %v1238_v62  ;;  %v1240_v1 = vand.u32 4294901760, %v1217_v63 }
 0x109   : > { %v786_v3 = vpop.f32.mrf.mxu0 }
 0x10a   : > { %v787_v4 = vadd.f32 %v786_v3, %v754_v2  ;;  %v1216_v2 = vld [vmem:[%s2272_s20 + $0x8] sm:$0xff]  ;;  %v1269_v3 = vand.u32 4294901760, %v1268_v0 }
 0x10b   : > { %v811_v5 = vpop.f32.mrf.mxu1 }
 0x10c   : > { %v812_v6 = vadd.f32 %v811_v5, %v787_v4  ;;  %v1274_v4 = vsub.f32 %v1217_v63, %v1240_v1  ;;  %v1242_v5 = vand.u32 4294901760, %v1216_v2 }
 0x10d   : > { %v615_v28 = vpop.xlane.xlu0 %614 }
 0x10e   : > { %v814_v7 = vmax.f32 %v812_v6, 0.0  ;;  %v1215_v6 = vld [vmem:[%s2272_s20] sm:$0xff] }
 0x110   : > { %v824_v8 = vsel %vm625_vm0, %v814_v7, 0  ;;  %v1270_v7 = vsub.f32 %v1268_v0, %v1269_v3 }
 0x111   : > { %v846_v9 = vand.u32 4294901760, %v824_v8 }
 0x113   : > { %v847_v10 = vsub.f32 %v824_v8, %v846_v9  ;;  %892 = vmatmul.f32.vlgmr.msrb.gmra.mxu3 %v846_v9  ;;  %v1275_v8 = vand.u32 4294901760, %v1274_v4 }
 0x114   : > { %1136 = vmatpush.msrb.mxu3 %v1035_v15 }
 0x115   : > { %922 = vmatmul.f32.vlgmr.msra.gmra.mxu0 %v847_v10  ;;  %v848_v11 = vand.u32 4294901760, %v847_v10 }
 0x116   : > { %1138 = vmatpush.msrb.mxu3 %v1037_v18  ;;  %1165 = vmatpush.msra.mxu0 %v1066_v20 }
 0x117   : > { %949 = vmatmul.f32.vlgmr.msra.gmra.mxu1 %v848_v11  ;;  %v849_v12 = vsub.f32 %v847_v10, %v848_v11  ;;  %v1244_v10 = vand.u32 4294901760, %v1215_v6  ;;  %v1271_v11 = vand.u32 4294901760, %v1270_v7 }
 0x118   : > { %1140 = vmatpush.msrb.mxu3 %v1039_v22  ;;  %1169 = vmatpush.msra.mxu0 %v1072_v25 }
 0x119   : > { %v850_v13 = vand.u32 4294901760, %v849_v12  ;;  %1196 = vmatpush.msra.mxu1 %v1035_v15  ;;  %v1276_v12 = vsub.f32 %v1274_v4, %v1275_v8  ;;  %v1286_v14 = vsub.f32 %v1215_v6, %v1244_v10 }
 0x11a   : > { %1142 = vmatpush.msrb.mxu3 %v1041_v27  ;;  %1173 = vmatpush.msra.mxu0 %v1078_v30 }
 0x11b   : > { %851 = vmatmul.f32.vlgmr.msrb.gmra.mxu2 %v850_v13  ;;  %1007 = vmatmul.f32.vlgmr.msra.gmra.mxu3 %v846_v9  ;;  %v1277_v15 = vand.u32 4294901760, %v1276_v12 }
 0x11c   : > { %1107 = vmatpush.msrb.mxu2 %v1065_v17  ;;  %1177 = vmatpush.msra.mxu0 %v1084_v34  ;;  %v1287_v17 = vand.u32 4294901760, %v1286_v14 }
 0x11d   : > { %1198 = vmatpush.msra.mxu1 %v1037_v18  ;;  %1272 = vmatpush.msra.mxu3 %v1271_v11 }
 0x11e   : > { %1110 = vmatpush.msrb.mxu2 %v1071_v21  ;;  %v1288_v19 = vsub.f32 %v1286_v14, %v1287_v17 }
 0x11f   : > { %1200 = vmatpush.msra.mxu1 %v1039_v22  ;;  %1278 = vmatpush.msra.mxu3 %v1277_v15 }
 0x120   : > { %1113 = vmatpush.msrb.mxu2 %v1077_v26  ;;  %v1289_v20 = vand.u32 4294901760, %v1288_v19  ;;  %v1665_v26 = vld [vmem:[%s2273_s9] ss:$0 sm:$0xff] }
 0x121   : > { %1202 = vmatpush.msra.mxu1 %v1041_v27  ;;  %v1015_v32 = vmul.f32 %v1665_v26, %v615_v28 }
 0x122   : > { %1116 = vmatpush.msrb.mxu2 %v1083_v31 }
 0x123   : > { %982 = vmatmul.f32.vlgmr.msra.gmra.mxu2 %v846_v9  ;;  %v1280_v9 = vsub.f32 %v1216_v2, %v1242_v5 }
 0x124   : > { %1239 = vmatpush.msra.mxu2 %v1238_v62 }
 0x125   : > { %v1281_v13 = vand.u32 4294901760, %v1280_v9 }
 0x126   : > { %1241 = vmatpush.msra.mxu2 %v1240_v1 }
 0x127   : > { %v1282_v16 = vsub.f32 %v1280_v9, %v1281_v13 }
 0x128   : > { %1243 = vmatpush.msra.mxu2 %v1242_v5 }
 0x129   : > { %v1283_v18 = vand.u32 4294901760, %v1282_v16 }
 0x12a   : > { %1245 = vmatpush.msra.mxu2 %v1244_v10 }
 0x12b   : > { %1284 = vmatpush.msra.mxu3 %v1283_v18 }
 0x12d   : > { %1290 = vmatpush.msra.mxu3 %v1289_v20 }
 0x192   : > { %v923_v47 = vpop.f32.mrf.mxu0 }
 0x194   : > { %v950_v49 = vpop.f32.mrf.mxu1 }
 0x196   : > { %v893_v39 = vpop.f32.mrf.mxu3 }
 0x19e   : > { %v852_v40 = vpop.f32.mrf.mxu2  ;;  %v1008_v53 = vpop.f32.mrf.mxu3 }
 0x19f   : > { %v853_v43 = vadd.f32 %v1664_v38, %v852_v40 }
 0x1a1   : > { %v894_v45 = vadd.f32 %v893_v39, %v853_v43 }
 0x1a3   : > { %v924_v48 = vadd.f32 %v923_v47, %v894_v45  ;;  %v1667_v45 = vld [vmem:[#allocation2] ss:$0 sm:$0xff] }
 0x1a5   : > { %v951_v50 = vadd.f32 %v950_v49, %v924_v48 }
 0x1a6   : > { %v983_v51 = vpop.f32.mrf.mxu2 }
 0x1a7   : > { %v984_v52 = vadd.f32 %v983_v51, %v951_v50 }
 0x1a9   : > { %v1009_v54 = vadd.f32 %v1008_v53, %v984_v52 }
 0x1ab   : > { %v1021_v55 = vsel %vm625_vm0, %v1009_v54, 0 }
 0x1ac   : > { %v1043_v56 = vand.u32 4294901760, %v1021_v55 }
 0x1ae   : > { %v1044_v57 = vsub.f32 %v1021_v55, %v1043_v56  ;;  %1089 = vmatmul.f32.vlgmr.msrb.gmra.mxu1 %v1043_v56 }
 0x1af   : > { %1339 = vmatpush.msrb.mxu1 %v1238_v62 }
 0x1b0   : > { %1119 = vmatmul.f32.vlgmr.msrb.gmra.mxu2 %v1044_v57  ;;  %v1045_v58 = vand.u32 4294901760, %v1044_v57 }
 0x1b1   : > { %1341 = vmatpush.msrb.mxu1 %v1240_v1  ;;  %1368 = vmatpush.msrb.mxu2 %v1269_v3 }
 0x1b2   : > { %1146 = vmatmul.f32.vlgmr.msrb.gmra.mxu3 %v1045_v58  ;;  %v1046_v59 = vsub.f32 %v1044_v57, %v1045_v58 }
 0x1b3   : > { %1343 = vmatpush.msrb.mxu1 %v1242_v5  ;;  %1372 = vmatpush.msrb.mxu2 %v1275_v8 }
 0x1b4   : > { %v1047_v60 = vand.u32 4294901760, %v1046_v59  ;;  %1399 = vmatpush.msrb.mxu3 %v1238_v62 }
 0x1b5   : > { %1345 = vmatpush.msrb.mxu1 %v1244_v10  ;;  %1376 = vmatpush.msrb.mxu2 %v1281_v13 }
 0x1b6   : > { %1048 = vmatmul.f32.vlgmr.msrb.gmra.mxu0 %v1047_v60  ;;  %1204 = vmatmul.f32.vlgmr.msra.gmra.mxu1 %v1043_v56 }
 0x1b7   : > { %1310 = vmatpush.msrb.mxu0 %v1268_v0  ;;  %1380 = vmatpush.msrb.mxu2 %v1287_v17 }
 0x1b8   : > { %1401 = vmatpush.msrb.mxu3 %v1240_v1 }
 0x1b9   : > { %1313 = vmatpush.msrb.mxu0 %v1274_v4 }
 0x1ba   : > { %1403 = vmatpush.msrb.mxu3 %v1242_v5 }
 0x1bb   : > { %1316 = vmatpush.msrb.mxu0 %v1280_v9 }
 0x1bc   : > { %1405 = vmatpush.msrb.mxu3 %v1244_v10 }
 0x1bd   : > { %1319 = vmatpush.msrb.mxu0 %v1286_v14 }
 0x1be   : > { %1179 = vmatmul.f32.vlgmr.msra.gmra.mxu0 %v1043_v56 }
 0x22b   : > { %v1090_v21 = vpop.f32.mrf.mxu1 }
 0x233   : > { %v1049_v22 = vpop.f32.mrf.mxu0  ;;  %v1120_v24 = vpop.f32.mrf.mxu2 }
 0x234   : > { %v1091_v23 = vadd.f32 %v1090_v21, %v1049_v22  ;;  %v1205_v33 = vpop.f32.mrf.mxu1 }
 0x235   : > { %v1147_v27 = vpop.f32.mrf.mxu3 }
 0x236   : > { %v1121_v25 = vadd.f32 %v1120_v24, %v1091_v23 }
 0x238   : > { %v1148_v29 = vadd.f32 %v1147_v27, %v1121_v25 }
 0x23b   : > { %v1180_v30 = vpop.f32.mrf.mxu0 }
 0x23c   : > { %v1181_v31 = vadd.f32 %v1180_v30, %v1148_v29 }
 0x23e   : > { %v1206_v34 = vadd.f32 %v1205_v33, %v1181_v31 }
 0x240   : > { %v1208_v36 = vadd.f32 %v1206_v34, %v1015_v32 }
 0x242   : > { %v1213_v37 = vadd.f32 %v1666_v35, %v1208_v36 }
 0x244   : > { %v1214_v38 = vmax.f32 %v1213_v37, 0.0 }
 0x246   : > { %v1224_v39 = vsel %vm625_vm0, %v1214_v38, 0 }
 0x247   : > { %v1246_v40 = vand.u32 4294901760, %v1224_v39 }
 0x249   : > { %1292 = vmatmul.f32.vlgmr.msra.gmra.mxu3 %v1246_v40  ;;  %v1247_v41 = vsub.f32 %v1224_v39, %v1246_v40 }
 0x24b   : > { %1322 = vmatmul.f32.vlgmr.msrb.gmra.mxu0 %v1247_v41  ;;  %v1248_v42 = vand.u32 4294901760, %v1247_v41 }
 0x24d   : > { %1349 = vmatmul.f32.vlgmr.msrb.gmra.mxu1 %v1248_v42  ;;  %v1249_v43 = vsub.f32 %v1247_v41, %v1248_v42 }
 0x24f   : > { %v1250_v44 = vand.u32 4294901760, %v1249_v43 }
 0x251   : > { %1251 = vmatmul.f32.vlgmr.msra.gmra.mxu2 %v1250_v44  ;;  %1407 = vmatmul.f32.vlgmr.msrb.gmra.mxu3 %v1246_v40 }
 0x259   : > { %1382 = vmatmul.f32.vlgmr.msrb.gmra.mxu2 %v1246_v40 }
 0x2c8   : > { %v1323_v50 = vpop.f32.mrf.mxu0 }
 0x2ca   : > { %v1350_v52 = vpop.f32.mrf.mxu1 }
 0x2cc   : > { %v1293_v46 = vpop.f32.mrf.mxu3 }
 0x2d4   : > { %v1252_v47 = vpop.f32.mrf.mxu2  ;;  %v1408_v56 = vpop.f32.mrf.mxu3 }
 0x2d5   : > { %v1253_v48 = vadd.f32 %v1667_v45, %v1252_v47 }
 0x2d7   : > { %v1294_v49 = vadd.f32 %v1293_v46, %v1253_v48 }
 0x2d9   : > { %v1324_v51 = vadd.f32 %v1323_v50, %v1294_v49 }
 0x2db   : > { %v1351_v53 = vadd.f32 %v1350_v52, %v1324_v51 }
 0x2dc   : > { %v1383_v54 = vpop.f32.mrf.mxu2 }
 0x2dd   : > { %v1384_v55 = vadd.f32 %v1383_v54, %v1351_v53 }
 0x2df   : > { %v1409_v57 = vadd.f32 %v1408_v56, %v1384_v55 }
 0x2e1   : > { %1412 = vst.msk [vmem:[%s606_s19] sm:$0xff] %vm1411_vm2, %v1409_v57 }
 0x2e2 PF: > { %s2276_s30 = sld [smem:[#allocation18_spill]]  ;;  %s2278_s27 = smov %s1890_s28 }
 0x2e3   : > { %s2277_s16 = sld [smem:[#allocation19_spill]]  ;;  %s2279_s28 = smov %s1894_s29 }
 0x2e8   : > { %p32_p4 = scmp.ge.s32.totalorder %s2276_s30, 4  }
 0x2e9   : > { %s2280_s29 = smov %s2277_s16 }
 0x2ea   :  { %34 = sbr.rel (!%p32_p4) target bundleno = 16 (0x10), region = 157 }
 0x2ef   :  { %1432 = vsyncpa [#allocation4], 1 }
 0x2f0   :  { %1434 = vsyncpa [#allocation4 + $0x1], 1 }
 0x2f1   :  { %1435 = vsyncpa [#allocation6], 1 }
 0x2f2   :  { %1437 = vsyncpa [#allocation6 + $0x1], 1 }
 0x2f3   :  { %1438 = vsyncpa [#allocation9], 1 }
 0x2f4   :  { %1440 = vsyncpa [#allocation9 + $0x1], 1 }
 0x2f5   :  { %1441 = vsyncpa [#allocation12], 1 }

</bundles_post_ra>
